<compile_context>
chip_gen: v5e
topology: v5e:2x2
jax: 0.10.0
libtpu: 0.0.40
codegen_flags: <defaults>
</compile_context>

<pallas_src>
import functools

import jax
import jax.numpy as jnp
from jax import lax
from jax.experimental import pallas as pl
from jax.experimental.pallas import tpu as pltpu

EPS = 1e-5        # nn.GroupNorm default eps
_MXU_MIN_C = 9    # channel counts >= this use the MXU for the 1x1 convs


def _tfcm_kernel(x_ref, tb_ref, w1_ref, w2_ref, wd_ref, vecs_ref, tmask_ref,
                 out_ref, ypad_ref, *, C, F, T, dila, pad_left, pad_right,
                 istart):
    f32 = jnp.float32
    FT = F * T
    PADL = T + pad_left          # zeros needed immediately left of the interior
    PADR = T + pad_right         # zeros needed right of the interior
    inv_n = 1.0 / float(C * FT)

    # Packed per-channel parameters, each (C, 1) -> lane-broadcast over F*T.
    b1 = vecs_ref[:, 0:1].astype(f32)
    g1 = vecs_ref[:, 1:2].astype(f32)
    be1 = vecs_ref[:, 2:3].astype(f32)
    a1 = vecs_ref[:, 3:4].astype(f32)
    bd = vecs_ref[:, 4:5].astype(f32)
    g2 = vecs_ref[:, 5:6].astype(f32)
    be2 = vecs_ref[:, 6:7].astype(f32)
    a2 = vecs_ref[:, 7:8].astype(f32)
    b2 = vecs_ref[:, 8:9].astype(f32)

    def pointwise(w_ref, row, full):
        # 1x1 conv (channel mixing).  Tiny C: C broadcast-FMAs on the VPU over
        # the lane-dense (C, F*T) block.  Otherwise: one MXU matmul at default
        # precision with f32 accumulation (MXU is otherwise idle here; this
        # frees the binding VALU slot for the depthwise conv + GroupNorm).
        if C < _MXU_MIN_C:
            acc = w_ref[:, 0:1].astype(f32) * row(0)
            for c in range(1, C):
                acc = acc + w_ref[:, c:c + 1].astype(f32) * row(c)
            return acc
        return jnp.dot(w_ref[...].astype(f32), full(),
                       preferred_element_type=f32)

    def gn_prelu(v, g, be, a):
        # GroupNorm(num_groups=1): fused single-pass stats (sum / sum-of-squares
        # in f32; fine at these magnitudes -- TODO(synk): two-pass variance for
        # very large C*F*T), then the affine folded into one scale/shift.
        s = jnp.sum(v)
        ss = jnp.sum(v * v)
        mu = s * inv_n
        var = jnp.maximum(ss * inv_n - mu * mu, 0.0)
        rstd = lax.rsqrt(var + EPS)
        scale = g * rstd                       # (C, 1)
        shift = be - mu * scale                # (C, 1)
        vh = v * scale + shift
        return jnp.where(vh >= 0.0, vh, a * vh)   # PReLU(C)

    # ---- pconv1: 1x1 conv + GroupNorm + PReLU, then time-embedding injection ----
    y = pointwise(w1_ref,
                  lambda c: x_ref[0, c:c + 1, :].astype(f32),
                  lambda: x_ref[0].astype(f32)) + b1
    y = gn_prelu(y, g1, be1, a1)
    y = y + tb_ref[0].astype(f32)                          # (C, 1) broadcast add

    # ---- dila_conv: ConstantPad2d + depthwise dilated 3x3 + GroupNorm + PReLU ----
    # Zero-padded flat scratch: F-boundary zeros come from the pads; the
    # T-boundary wraparound is removed by the per-tap lane masks (factored out
    # of the F-tap loop below).  The pads are re-zeroed every step on purpose:
    # the "parallel" B axis may be sharded across TensorCores (v7x megacore)
    # and each core owns its own scratch, so a program_id==0-only init is not
    # safe.  The interior starts at a 128-aligned column (unmasked big store).
    ypad_ref[:, istart - PADL:istart] = jnp.zeros((C, PADL), f32)
    ypad_ref[:, istart + FT:istart + FT + PADR] = jnp.zeros((C, PADR), f32)
    ypad_ref[:, istart:istart + FT] = y

    z = None
    for j in range(3):                                     # T taps (dilation `dila`)
        dt = j * dila - pad_left
        # Taps with |dt| >= T read *only* zero padding in the reference (the
        # module pads T by exactly (pad_left, pad_right)), so skipping them is
        # exact for any pad configuration produced by this module.
        if dt <= -T or dt >= T:
            continue
        part = None
        for i in range(3):                                 # F taps (dilation 1)
            start = istart + (i - 1) * T + dt
            tap = wd_ref[:, i * 3 + j:i * 3 + j + 1].astype(f32)   # (C, 1)
            contrib = tap * ypad_ref[:, start:start + FT]
            part = contrib if part is None else part + contrib
        if dt != 0:
            part = part * tmask_ref[j:j + 1, :]            # one mask mul per j
        z = part if z is None else z + part
    z = gn_prelu(z + bd, g2, be2, a2)

    # ---- pconv2: 1x1 conv + residual (x re-read from its ref, z used as value) ----
    o = pointwise(w2_ref, lambda c: z[c:c + 1, :], lambda: z) + b2
    out_ref[0] = (o + x_ref[0].astype(f32)).astype(out_ref.dtype)


def tfcm_block(inps, temb, params, *, dila=1, causal=True):
    """inps: (B, C, F, T) NCHW (PyTorch convention); temb: (B, temb_dim)."""
    B, C, F, T = inps.shape
    FT = F * T
    dila_pad = dila * 2                                    # dila * (K[1]-1), K=(3,3)
    if causal:
        pad_left, pad_right = dila_pad, 0
    else:
        pad_left = pad_right = dila_pad // 2
    PADL, PADR = T + pad_left, T + pad_right
    istart = ((PADL + 127) // 128) * 128                   # 128-aligned interior start
    W = istart + FT + PADR                                 # scratch width

    # Lane-dense channel-major view; reshape of contiguous minor dims is free.
    x2 = inps.reshape(B, C, FT)

    # Time-embedding branch hoisted out of the kernel: one batched matmul.
    hp = jax.lax.Precision.HIGHEST
    tb = (jnp.dot(jax.nn.silu(temb.astype(jnp.float32)), params["w_dense"].T,
                  precision=hp) + params["b_dense"]).reshape(B, C, 1)

    # Packed per-channel parameter columns (C, 9) and depthwise taps (C, 9).
    vecs = jnp.stack([params["b1"], params["g1"], params["be1"], params["a1"],
                      params["bd"], params["g2"], params["be2"], params["a2"],
                      params["b2"]], axis=1)
    wd = params["wd"][:, 0].reshape(C, 9)                  # (C,1,3,3) -> (C, 9)

    # Per-tap T-boundary validity masks (F boundary handled by the zero pads).
    tpos = jnp.arange(FT, dtype=jnp.int32) % T
    tmask = jnp.stack(
        [((tpos + (j * dila - pad_left) >= 0)
          & (tpos + (j * dila - pad_left) < T)).astype(jnp.float32)
         for j in range(3)], axis=0)                       # (3, F*T)

    kernel = functools.partial(_tfcm_kernel, C=C, F=F, T=T, dila=dila,
                               pad_left=pad_left, pad_right=pad_right,
                               istart=istart)

    # Scoped-VMEM limit from the actual per-step footprint (dtype-aware):
    # x / out blocks double-buffered, grid-invariant weights double-buffered,
    # plus the f32 scratch.  32 MiB floor is safe on v5e/v6e/v7x; only lift it
    # (up to 100 MiB, v5e/v6e territory) when the footprint requires it.
    itemsize = jnp.dtype(inps.dtype).itemsize
    blk_io = C * FT * itemsize
    consts = (2 * C * C + 2 * C * 9 + 3 * FT + C) * 4
    need = 2 * 2 * blk_io + 2 * consts + C * W * 4 + (4 << 20)
    vmem_limit = int(min(max(need, 32 << 20), 100 << 20))

    out2 = pl.pallas_call(
        kernel,
        out_shape=jax.ShapeDtypeStruct((B, C, FT), inps.dtype),
        grid=(B,),
        in_specs=[
            pl.BlockSpec((1, C, FT), lambda b: (b, 0, 0)),   # x (flattened F*T)
            pl.BlockSpec((1, C, 1), lambda b: (b, 0, 0)),    # Dense_0(act(temb))
            pl.BlockSpec((C, C), lambda b: (0, 0)),          # pconv1 weight
            pl.BlockSpec((C, C), lambda b: (0, 0)),          # pconv2 weight
            pl.BlockSpec((C, 9), lambda b: (0, 0)),          # depthwise taps
            pl.BlockSpec((C, 9), lambda b: (0, 0)),          # packed per-channel params
            pl.BlockSpec((3, FT), lambda b: (0, 0)),         # T-boundary masks
        ],
        out_specs=pl.BlockSpec((1, C, FT), lambda b: (b, 0, 0)),
        scratch_shapes=[pltpu.VMEM((C, W), jnp.float32)],
        compiler_params=pltpu.CompilerParams(
            dimension_semantics=("parallel",),
            vmem_limit_bytes=vmem_limit),
    )(x2, tb, params["w1"], params["w2"], wd, vecs, tmask)

    return out2.reshape(B, C, F, T)


# ---------------- deterministic parameter init (synthetic, no checkpoint) --------
def init_params(key, cin, temb_dim):
    ks = jax.random.split(key, 8)
    p = {}
    p["w_dense"] = jax.random.normal(ks[0], (cin, temb_dim), jnp.float32) / jnp.sqrt(temb_dim)
    p["b_dense"] = jnp.zeros((cin,), jnp.float32)                  # nn.init.zeros_
    p["w1"] = jax.random.normal(ks[1], (cin, cin), jnp.float32) / jnp.sqrt(cin)
    p["b1"] = 0.1 * jax.random.normal(ks[2], (cin,), jnp.float32)
    p["g1"] = 1.0 + 0.1 * jax.random.normal(ks[3], (cin,), jnp.float32)
    p["be1"] = 0.1 * jax.random.normal(ks[4], (cin,), jnp.float32)
    p["a1"] = jnp.full((cin,), 0.25, jnp.float32)                  # PReLU default
    p["wd"] = jax.random.normal(ks[5], (cin, 1, 3, 3), jnp.float32) / 3.0
    p["bd"] = 0.1 * jax.random.normal(ks[6], (cin,), jnp.float32)
    p["g2"] = jnp.ones((cin,), jnp.float32)
    p["be2"] = jnp.zeros((cin,), jnp.float32)
    p["a2"] = jnp.full((cin,), 0.25, jnp.float32)
    p["w2"] = jax.random.normal(ks[7], (cin, cin), jnp.float32) / jnp.sqrt(cin)
    p["b2"] = jnp.zeros((cin,), jnp.float32)
    return p


# ---------------- pure-JAX reference (NCHW, mirrors the torch module) -------------
def _groupnorm1(x, gamma, beta):
    mu = jnp.mean(x, axis=(1, 2, 3), keepdims=True)
    var = jnp.mean((x - mu) ** 2, axis=(1, 2, 3), keepdims=True)
    xh = (x - mu) * lax.rsqrt(var + EPS)
    return xh * gamma[None, :, None, None] + beta[None, :, None, None]


def _prelu(x, a):
    return jnp.where(x >= 0, x, a[None, :, None, None] * x)


def reference(inps, temb, p, *, dila=1, causal=True):
    C = inps.shape[1]
    dila_pad = dila * 2
    hp = jax.lax.Precision.HIGHEST
    y = jnp.einsum("oc,bcft->boft", p["w1"], inps, precision=hp) + p["b1"][None, :, None, None]
    y = _prelu(_groupnorm1(y, p["g1"], p["be1"]), p["a1"])
    tb = jnp.einsum("bd,od->bo", jax.nn.silu(temb), p["w_dense"], precision=hp) + p["b_dense"]
    y = y + tb[:, :, None, None]
    if causal:
        yp = jnp.pad(y, ((0, 0), (0, 0), (1, 1), (dila_pad, 0)))
    else:
        yp = jnp.pad(y, ((0, 0), (0, 0), (1, 1), (dila_pad // 2, dila_pad // 2)))
    z = lax.conv_general_dilated(
        yp, p["wd"], window_strides=(1, 1), padding="VALID", rhs_dilation=(1, dila),
        dimension_numbers=("NCHW", "OIHW", "NCHW"), feature_group_count=C, precision=hp)
    z = z + p["bd"][None, :, None, None]
    z = _prelu(_groupnorm1(z, p["g2"], p["be2"]), p["a2"])
    o = jnp.einsum("oc,bcft->boft", p["w2"], z, precision=hp) + p["b2"][None, :, None, None]
    return o + inps


if __name__ == "__main__":
    key = jax.random.PRNGKey(0)
    B, F, T, temb_dim = 2, 8, 16, 32
    k1, k2, k3, k4 = jax.random.split(key, 4)
    temb = jax.random.normal(k2, (B, temb_dim), jnp.float32)

    # --- small-C configs: VPU broadcast-FMA pointwise path (exact f32) ---
    C = 8
    inps = jax.random.normal(k1, (B, C, F, T), jnp.float32)
    params = init_params(k3, C, temb_dim)
    for dila, causal in ((1, True), (2, False)):
        out = jax.block_until_ready(tfcm_block(inps, temb, params, dila=dila, causal=causal))
        ref = reference(inps, temb, params, dila=dila, causal=causal)
        assert out.shape == inps.shape
        if not jnp.allclose(out, ref, atol=1e-3, rtol=1e-3):
            raise AssertionError(
                f"mismatch (C={C}, dila={dila}, causal={causal}): "
                f"max abs err = {float(jnp.max(jnp.abs(out - ref)))}")

    # --- module-default C=24: MXU pointwise path.  The in-kernel 1x1 convs run
    # on the MXU at default precision (bf16-rounded inputs, f32 accumulation),
    # so compare against the fp32 reference with a correspondingly loose bound.
    C = 24
    inps = jax.random.normal(k4, (B, C, F, T), jnp.float32)
    params = init_params(jax.random.fold_in(k3, 1), C, temb_dim)
    out = jax.block_until_ready(tfcm_block(inps, temb, params, dila=2, causal=True))
    ref = reference(inps, temb, params, dila=2, causal=True)
    assert out.shape == inps.shape
    if not jnp.allclose(out, ref, atol=5e-2, rtol=5e-2):
        raise AssertionError(
            f"mismatch (C={C}, MXU path): "
            f"max abs err = {float(jnp.max(jnp.abs(out - ref)))}")

    print("KERNEL_OK")
</pallas_src>

<mosaic_0001>
module attributes {stable_mosaic.version = 11 : i64} {
  func.func @_tfcm_kernel(%arg0: i32, %arg1: memref<1x8x128xf32, #tpu.memory_space<vmem>>, %arg2: memref<1x8x1xf32, #tpu.memory_space<vmem>>, %arg3: memref<8x8xf32, #tpu.memory_space<vmem>>, %arg4: memref<8x8xf32, #tpu.memory_space<vmem>>, %arg5: memref<8x9xf32, #tpu.memory_space<vmem>>, %arg6: memref<8x9xf32, #tpu.memory_space<vmem>>, %arg7: memref<3x128xf32, #tpu.memory_space<vmem>>, %arg8: memref<1x8x128xf32, #tpu.memory_space<vmem>>, %arg9: memref<8x272xf32, #tpu.memory_space<vmem>>) attributes {dimension_semantics = [#tpu.dimension_semantics<parallel>], iteration_bounds = array<i64: 2>, scalar_prefetch = 0 : i64, scratch_operands = 1 : i64, tpu.core_type = #tpu.core_type<tc>, window_params = [{transform_indices = @transform_0, window_bounds = array<i64: 1, 8, 128>}, {transform_indices = @transform_1, window_bounds = array<i64: 1, 8, 1>}, {pipeline_mode = #tpu.pipeline_mode<synchronous>, transform_indices = @transform_2, window_bounds = array<i64: 8, 8>}, {pipeline_mode = #tpu.pipeline_mode<synchronous>, transform_indices = @transform_3, window_bounds = array<i64: 8, 8>}, {pipeline_mode = #tpu.pipeline_mode<synchronous>, transform_indices = @transform_4, window_bounds = array<i64: 8, 9>}, {pipeline_mode = #tpu.pipeline_mode<synchronous>, transform_indices = @transform_5, window_bounds = array<i64: 8, 9>}, {pipeline_mode = #tpu.pipeline_mode<synchronous>, transform_indices = @transform_6, window_bounds = array<i64: 3, 128>}, {transform_indices = @transform_7, window_bounds = array<i64: 1, 8, 128>}]} {
    %c0 = arith.constant 0 : index
    %c0_0 = arith.constant 0 : index
    %0 = vector.load %arg6[%c0, %c0_0] : memref<8x9xf32, #tpu.memory_space<vmem>>, vector<8x1xf32>
    %c0_1 = arith.constant 0 : index
    %c1 = arith.constant 1 : index
    %1 = vector.load %arg6[%c0_1, %c1] : memref<8x9xf32, #tpu.memory_space<vmem>>, vector<8x1xf32>
    %c0_2 = arith.constant 0 : index
    %c2 = arith.constant 2 : index
    %2 = vector.load %arg6[%c0_2, %c2] : memref<8x9xf32, #tpu.memory_space<vmem>>, vector<8x1xf32>
    %c0_3 = arith.constant 0 : index
    %c3 = arith.constant 3 : index
    %3 = vector.load %arg6[%c0_3, %c3] : memref<8x9xf32, #tpu.memory_space<vmem>>, vector<8x1xf32>
    %c0_4 = arith.constant 0 : index
    %c4 = arith.constant 4 : index
    %4 = vector.load %arg6[%c0_4, %c4] : memref<8x9xf32, #tpu.memory_space<vmem>>, vector<8x1xf32>
    %c0_5 = arith.constant 0 : index
    %c5 = arith.constant 5 : index
    %5 = vector.load %arg6[%c0_5, %c5] : memref<8x9xf32, #tpu.memory_space<vmem>>, vector<8x1xf32>
    %c0_6 = arith.constant 0 : index
    %c6 = arith.constant 6 : index
    %6 = vector.load %arg6[%c0_6, %c6] : memref<8x9xf32, #tpu.memory_space<vmem>>, vector<8x1xf32>
    %c0_7 = arith.constant 0 : index
    %c7 = arith.constant 7 : index
    %7 = vector.load %arg6[%c0_7, %c7] : memref<8x9xf32, #tpu.memory_space<vmem>>, vector<8x1xf32>
    %c0_8 = arith.constant 0 : index
    %c8 = arith.constant 8 : index
    %8 = vector.load %arg6[%c0_8, %c8] : memref<8x9xf32, #tpu.memory_space<vmem>>, vector<8x1xf32>
    %c0_9 = arith.constant 0 : index
    %c0_10 = arith.constant 0 : index
    %9 = vector.load %arg3[%c0_9, %c0_10] : memref<8x8xf32, #tpu.memory_space<vmem>>, vector<8x1xf32>
    %c0_11 = arith.constant 0 : index
    %c0_12 = arith.constant 0 : index
    %c0_13 = arith.constant 0 : index
    %10 = vector.load %arg1[%c0_11, %c0_12, %c0_13] : memref<1x8x128xf32, #tpu.memory_space<vmem>>, vector<1x1x128xf32>
    %11 = vector.shape_cast %10 : vector<1x1x128xf32> to vector<1x128xf32>
    %12 = vector.broadcast %9 : vector<8x1xf32> to vector<8x128xf32>
    %13 = vector.broadcast %11 : vector<1x128xf32> to vector<8x128xf32>
    %14 = arith.mulf %12, %13 : vector<8x128xf32>
    %c0_14 = arith.constant 0 : index
    %c1_15 = arith.constant 1 : index
    %15 = vector.load %arg3[%c0_14, %c1_15] : memref<8x8xf32, #tpu.memory_space<vmem>>, vector<8x1xf32>
    %c0_16 = arith.constant 0 : index
    %c1_17 = arith.constant 1 : index
    %c0_18 = arith.constant 0 : index
    %16 = vector.load %arg1[%c0_16, %c1_17, %c0_18] : memref<1x8x128xf32, #tpu.memory_space<vmem>>, vector<1x1x128xf32>
    %17 = vector.shape_cast %16 : vector<1x1x128xf32> to vector<1x128xf32>
    %18 = vector.broadcast %15 : vector<8x1xf32> to vector<8x128xf32>
    %19 = vector.broadcast %17 : vector<1x128xf32> to vector<8x128xf32>
    %20 = arith.mulf %18, %19 : vector<8x128xf32>
    %21 = arith.addf %14, %20 : vector<8x128xf32>
    %c0_19 = arith.constant 0 : index
    %c2_20 = arith.constant 2 : index
    %22 = vector.load %arg3[%c0_19, %c2_20] : memref<8x8xf32, #tpu.memory_space<vmem>>, vector<8x1xf32>
    %c0_21 = arith.constant 0 : index
    %c2_22 = arith.constant 2 : index
    %c0_23 = arith.constant 0 : index
    %23 = vector.load %arg1[%c0_21, %c2_22, %c0_23] : memref<1x8x128xf32, #tpu.memory_space<vmem>>, vector<1x1x128xf32>
    %24 = vector.shape_cast %23 : vector<1x1x128xf32> to vector<1x128xf32>
    %25 = vector.broadcast %22 : vector<8x1xf32> to vector<8x128xf32>
    %26 = vector.broadcast %24 : vector<1x128xf32> to vector<8x128xf32>
    %27 = arith.mulf %25, %26 : vector<8x128xf32>
    %28 = arith.addf %21, %27 : vector<8x128xf32>
    %c0_24 = arith.constant 0 : index
    %c3_25 = arith.constant 3 : index
    %29 = vector.load %arg3[%c0_24, %c3_25] : memref<8x8xf32, #tpu.memory_space<vmem>>, vector<8x1xf32>
    %c0_26 = arith.constant 0 : index
    %c3_27 = arith.constant 3 : index
    %c0_28 = arith.constant 0 : index
    %30 = vector.load %arg1[%c0_26, %c3_27, %c0_28] : memref<1x8x128xf32, #tpu.memory_space<vmem>>, vector<1x1x128xf32>
    %31 = vector.shape_cast %30 : vector<1x1x128xf32> to vector<1x128xf32>
    %32 = vector.broadcast %29 : vector<8x1xf32> to vector<8x128xf32>
    %33 = vector.broadcast %31 : vector<1x128xf32> to vector<8x128xf32>
    %34 = arith.mulf %32, %33 : vector<8x128xf32>
    %35 = arith.addf %28, %34 : vector<8x128xf32>
    %c0_29 = arith.constant 0 : index
    %c4_30 = arith.constant 4 : index
    %36 = vector.load %arg3[%c0_29, %c4_30] : memref<8x8xf32, #tpu.memory_space<vmem>>, vector<8x1xf32>
    %c0_31 = arith.constant 0 : index
    %c4_32 = arith.constant 4 : index
    %c0_33 = arith.constant 0 : index
    %37 = vector.load %arg1[%c0_31, %c4_32, %c0_33] : memref<1x8x128xf32, #tpu.memory_space<vmem>>, vector<1x1x128xf32>
    %38 = vector.shape_cast %37 : vector<1x1x128xf32> to vector<1x128xf32>
    %39 = vector.broadcast %36 : vector<8x1xf32> to vector<8x128xf32>
    %40 = vector.broadcast %38 : vector<1x128xf32> to vector<8x128xf32>
    %41 = arith.mulf %39, %40 : vector<8x128xf32>
    %42 = arith.addf %35, %41 : vector<8x128xf32>
    %c0_34 = arith.constant 0 : index
    %c5_35 = arith.constant 5 : index
    %43 = vector.load %arg3[%c0_34, %c5_35] : memref<8x8xf32, #tpu.memory_space<vmem>>, vector<8x1xf32>
    %c0_36 = arith.constant 0 : index
    %c5_37 = arith.constant 5 : index
    %c0_38 = arith.constant 0 : index
    %44 = vector.load %arg1[%c0_36, %c5_37, %c0_38] : memref<1x8x128xf32, #tpu.memory_space<vmem>>, vector<1x1x128xf32>
    %45 = vector.shape_cast %44 : vector<1x1x128xf32> to vector<1x128xf32>
    %46 = vector.broadcast %43 : vector<8x1xf32> to vector<8x128xf32>
    %47 = vector.broadcast %45 : vector<1x128xf32> to vector<8x128xf32>
    %48 = arith.mulf %46, %47 : vector<8x128xf32>
    %49 = arith.addf %42, %48 : vector<8x128xf32>
    %c0_39 = arith.constant 0 : index
    %c6_40 = arith.constant 6 : index
    %50 = vector.load %arg3[%c0_39, %c6_40] : memref<8x8xf32, #tpu.memory_space<vmem>>, vector<8x1xf32>
    %c0_41 = arith.constant 0 : index
    %c6_42 = arith.constant 6 : index
    %c0_43 = arith.constant 0 : index
    %51 = vector.load %arg1[%c0_41, %c6_42, %c0_43] : memref<1x8x128xf32, #tpu.memory_space<vmem>>, vector<1x1x128xf32>
    %52 = vector.shape_cast %51 : vector<1x1x128xf32> to vector<1x128xf32>
    %53 = vector.broadcast %50 : vector<8x1xf32> to vector<8x128xf32>
    %54 = vector.broadcast %52 : vector<1x128xf32> to vector<8x128xf32>
    %55 = arith.mulf %53, %54 : vector<8x128xf32>
    %56 = arith.addf %49, %55 : vector<8x128xf32>
    %c0_44 = arith.constant 0 : index
    %c7_45 = arith.constant 7 : index
    %57 = vector.load %arg3[%c0_44, %c7_45] : memref<8x8xf32, #tpu.memory_space<vmem>>, vector<8x1xf32>
    %c0_46 = arith.constant 0 : index
    %c7_47 = arith.constant 7 : index
    %c0_48 = arith.constant 0 : index
    %58 = vector.load %arg1[%c0_46, %c7_47, %c0_48] : memref<1x8x128xf32, #tpu.memory_space<vmem>>, vector<1x1x128xf32>
    %59 = vector.shape_cast %58 : vector<1x1x128xf32> to vector<1x128xf32>
    %60 = vector.broadcast %57 : vector<8x1xf32> to vector<8x128xf32>
    %61 = vector.broadcast %59 : vector<1x128xf32> to vector<8x128xf32>
    %62 = arith.mulf %60, %61 : vector<8x128xf32>
    %63 = arith.addf %56, %62 : vector<8x128xf32>
    %64 = vector.broadcast %0 : vector<8x1xf32> to vector<8x128xf32>
    %65 = arith.addf %63, %64 : vector<8x128xf32>
    %66 = vector.shape_cast %65 : vector<8x128xf32> to vector<1x8x128xf32>
    %cst = arith.constant dense<0.000000e+00> : vector<1xf32>
    %67 = vector.multi_reduction <add>, %66, %cst [1, 2] : vector<1x8x128xf32> to vector<1xf32>
    %68 = vector.shape_cast %67 : vector<1xf32> to vector<1x1x1xf32>
    %69 = vector.extract %68[0, 0, 0] : f32 from vector<1x1x1xf32>
    %70 = arith.mulf %65, %65 : vector<8x128xf32>
    %71 = vector.shape_cast %70 : vector<8x128xf32> to vector<1x8x128xf32>
    %cst_49 = arith.constant dense<0.000000e+00> : vector<1xf32>
    %72 = vector.multi_reduction <add>, %71, %cst_49 [1, 2] : vector<1x8x128xf32> to vector<1xf32>
    %73 = vector.shape_cast %72 : vector<1xf32> to vector<1x1x1xf32>
    %74 = vector.extract %73[0, 0, 0] : f32 from vector<1x1x1xf32>
    %cst_50 = arith.constant 9.765625E-4 : f32
    %75 = arith.mulf %69, %cst_50 : f32
    %cst_51 = arith.constant 9.765625E-4 : f32
    %76 = arith.mulf %74, %cst_51 : f32
    %77 = arith.mulf %75, %75 : f32
    %78 = arith.subf %76, %77 : f32
    %cst_52 = arith.constant 0.000000e+00 : f32
    %79 = arith.maximumf %78, %cst_52 : f32
    %cst_53 = arith.constant 9.99999974E-6 : f32
    %80 = arith.addf %79, %cst_53 : f32
    %81 = math.rsqrt %80 : f32
    %82 = vector.broadcast %81 : f32 to vector<8x1xf32>
    %83 = arith.mulf %1, %82 : vector<8x1xf32>
    %84 = vector.broadcast %75 : f32 to vector<8x1xf32>
    %85 = arith.mulf %84, %83 : vector<8x1xf32>
    %86 = arith.subf %2, %85 : vector<8x1xf32>
    %87 = vector.broadcast %83 : vector<8x1xf32> to vector<8x128xf32>
    %88 = arith.mulf %65, %87 : vector<8x128xf32>
    %89 = vector.broadcast %86 : vector<8x1xf32> to vector<8x128xf32>
    %90 = arith.addf %88, %89 : vector<8x128xf32>
    %cst_54 = arith.constant 0.000000e+00 : f32
    %91 = vector.broadcast %cst_54 : f32 to vector<8x128xf32>
    %92 = arith.cmpf oge, %90, %91 : vector<8x128xf32>
    %93 = vector.broadcast %3 : vector<8x1xf32> to vector<8x128xf32>
    %94 = arith.mulf %93, %90 : vector<8x128xf32>
    %95 = arith.select %92, %90, %94 : vector<8x128xi1>, vector<8x128xf32>
    %c0_55 = arith.constant 0 : index
    %c0_56 = arith.constant 0 : index
    %c0_57 = arith.constant 0 : index
    %96 = vector.load %arg2[%c0_55, %c0_56, %c0_57] : memref<1x8x1xf32, #tpu.memory_space<vmem>>, vector<1x8x1xf32>
    %97 = vector.shape_cast %96 : vector<1x8x1xf32> to vector<8x1xf32>
    %98 = vector.broadcast %97 : vector<8x1xf32> to vector<8x128xf32>
    %99 = arith.addf %95, %98 : vector<8x128xf32>
    %cst_58 = arith.constant 0.000000e+00 : f32
    %100 = vector.broadcast %cst_58 : f32 to vector<8x18xf32>
    %c0_59 = arith.constant 0 : index
    %c110 = arith.constant 110 : index
    %101 = vector.load %arg9[%c0_59, %c110] : memref<8x272xf32, #tpu.memory_space<vmem>>, vector<8x18xf32>
    tpu.vector_store %arg9[%c0_59, %c110], %100 {strides = array<i32>} : memref<8x272xf32, #tpu.memory_space<vmem>>, vector<8x18xf32>,
    %cst_60 = arith.constant 0.000000e+00 : f32
    %102 = vector.broadcast %cst_60 : f32 to vector<8x16xf32>
    %c0_61 = arith.constant 0 : index
    %c256 = arith.constant 256 : index
    %103 = vector.load %arg9[%c0_61, %c256] : memref<8x272xf32, #tpu.memory_space<vmem>>, vector<8x16xf32>
    tpu.vector_store %arg9[%c0_61, %c256], %102 {strides = array<i32>} : memref<8x272xf32, #tpu.memory_space<vmem>>, vector<8x16xf32>,
    %c0_62 = arith.constant 0 : index
    %c128 = arith.constant 128 : index
    %104 = vector.load %arg9[%c0_62, %c128] : memref<8x272xf32, #tpu.memory_space<vmem>>, vector<8x128xf32>
    tpu.vector_store %arg9[%c0_62, %c128], %99 {strides = array<i32>} : memref<8x272xf32, #tpu.memory_space<vmem>>, vector<8x128xf32>,
    %c0_63 = arith.constant 0 : index
    %c0_64 = arith.constant 0 : index
    %105 = vector.load %arg5[%c0_63, %c0_64] : memref<8x9xf32, #tpu.memory_space<vmem>>, vector<8x1xf32>
    %c0_65 = arith.constant 0 : index
    %c110_66 = arith.constant 110 : index
    %106 = vector.load %arg9[%c0_65, %c110_66] : memref<8x272xf32, #tpu.memory_space<vmem>>, vector<8x128xf32>
    %107 = vector.broadcast %105 : vector<8x1xf32> to vector<8x128xf32>
    %108 = arith.mulf %107, %106 : vector<8x128xf32>
    %c0_67 = arith.constant 0 : index
    %c3_68 = arith.constant 3 : index
    %109 = vector.load %arg5[%c0_67, %c3_68] : memref<8x9xf32, #tpu.memory_space<vmem>>, vector<8x1xf32>
    %c0_69 = arith.constant 0 : index
    %c126 = arith.constant 126 : index
    %110 = vector.load %arg9[%c0_69, %c126] : memref<8x272xf32, #tpu.memory_space<vmem>>, vector<8x128xf32>
    %111 = vector.broadcast %109 : vector<8x1xf32> to vector<8x128xf32>
    %112 = arith.mulf %111, %110 : vector<8x128xf32>
    %113 = arith.addf %108, %112 : vector<8x128xf32>
    %c0_70 = arith.constant 0 : index
    %c6_71 = arith.constant 6 : index
    %114 = vector.load %arg5[%c0_70, %c6_71] : memref<8x9xf32, #tpu.memory_space<vmem>>, vector<8x1xf32>
    %c0_72 = arith.constant 0 : index
    %c142 = arith.constant 142 : index
    %115 = vector.load %arg9[%c0_72, %c142] : memref<8x272xf32, #tpu.memory_space<vmem>>, vector<8x128xf32>
    %116 = vector.broadcast %114 : vector<8x1xf32> to vector<8x128xf32>
    %117 = arith.mulf %116, %115 : vector<8x128xf32>
    %118 = arith.addf %113, %117 : vector<8x128xf32>
    %c0_73 = arith.constant 0 : index
    %c0_74 = arith.constant 0 : index
    %119 = vector.load %arg7[%c0_73, %c0_74] : memref<3x128xf32, #tpu.memory_space<vmem>>, vector<1x128xf32>
    %120 = vector.broadcast %119 : vector<1x128xf32> to vector<8x128xf32>
    %121 = arith.mulf %118, %120 : vector<8x128xf32>
    %c0_75 = arith.constant 0 : index
    %c1_76 = arith.constant 1 : index
    %122 = vector.load %arg5[%c0_75, %c1_76] : memref<8x9xf32, #tpu.memory_space<vmem>>, vector<8x1xf32>
    %c0_77 = arith.constant 0 : index
    %c111 = arith.constant 111 : index
    %123 = vector.load %arg9[%c0_77, %c111] : memref<8x272xf32, #tpu.memory_space<vmem>>, vector<8x128xf32>
    %124 = vector.broadcast %122 : vector<8x1xf32> to vector<8x128xf32>
    %125 = arith.mulf %124, %123 : vector<8x128xf32>
    %c0_78 = arith.constant 0 : index
    %c4_79 = arith.constant 4 : index
    %126 = vector.load %arg5[%c0_78, %c4_79] : memref<8x9xf32, #tpu.memory_space<vmem>>, vector<8x1xf32>
    %c0_80 = arith.constant 0 : index
    %c127 = arith.constant 127 : index
    %127 = vector.load %arg9[%c0_80, %c127] : memref<8x272xf32, #tpu.memory_space<vmem>>, vector<8x128xf32>
    %128 = vector.broadcast %126 : vector<8x1xf32> to vector<8x128xf32>
    %129 = arith.mulf %128, %127 : vector<8x128xf32>
    %130 = arith.addf %125, %129 : vector<8x128xf32>
    %c0_81 = arith.constant 0 : index
    %c7_82 = arith.constant 7 : index
    %131 = vector.load %arg5[%c0_81, %c7_82] : memref<8x9xf32, #tpu.memory_space<vmem>>, vector<8x1xf32>
    %c0_83 = arith.constant 0 : index
    %c143 = arith.constant 143 : index
    %132 = vector.load %arg9[%c0_83, %c143] : memref<8x272xf32, #tpu.memory_space<vmem>>, vector<8x128xf32>
    %133 = vector.broadcast %131 : vector<8x1xf32> to vector<8x128xf32>
    %134 = arith.mulf %133, %132 : vector<8x128xf32>
    %135 = arith.addf %130, %134 : vector<8x128xf32>
    %c1_84 = arith.constant 1 : index
    %c0_85 = arith.constant 0 : index
    %136 = vector.load %arg7[%c1_84, %c0_85] : memref<3x128xf32, #tpu.memory_space<vmem>>, vector<1x128xf32>
    %137 = vector.broadcast %136 : vector<1x128xf32> to vector<8x128xf32>
    %138 = arith.mulf %135, %137 : vector<8x128xf32>
    %139 = arith.addf %121, %138 : vector<8x128xf32>
    %c0_86 = arith.constant 0 : index
    %c2_87 = arith.constant 2 : index
    %140 = vector.load %arg5[%c0_86, %c2_87] : memref<8x9xf32, #tpu.memory_space<vmem>>, vector<8x1xf32>
    %c0_88 = arith.constant 0 : index
    %c112 = arith.constant 112 : index
    %141 = vector.load %arg9[%c0_88, %c112] : memref<8x272xf32, #tpu.memory_space<vmem>>, vector<8x128xf32>
    %142 = vector.broadcast %140 : vector<8x1xf32> to vector<8x128xf32>
    %143 = arith.mulf %142, %141 : vector<8x128xf32>
    %c0_89 = arith.constant 0 : index
    %c5_90 = arith.constant 5 : index
    %144 = vector.load %arg5[%c0_89, %c5_90] : memref<8x9xf32, #tpu.memory_space<vmem>>, vector<8x1xf32>
    %c0_91 = arith.constant 0 : index
    %c128_92 = arith.constant 128 : index
    %145 = vector.load %arg9[%c0_91, %c128_92] : memref<8x272xf32, #tpu.memory_space<vmem>>, vector<8x128xf32>
    %146 = vector.broadcast %144 : vector<8x1xf32> to vector<8x128xf32>
    %147 = arith.mulf %146, %145 : vector<8x128xf32>
    %148 = arith.addf %143, %147 : vector<8x128xf32>
    %c0_93 = arith.constant 0 : index
    %c8_94 = arith.constant 8 : index
    %149 = vector.load %arg5[%c0_93, %c8_94] : memref<8x9xf32, #tpu.memory_space<vmem>>, vector<8x1xf32>
    %c0_95 = arith.constant 0 : index
    %c144 = arith.constant 144 : index
    %150 = vector.load %arg9[%c0_95, %c144] : memref<8x272xf32, #tpu.memory_space<vmem>>, vector<8x128xf32>
    %151 = vector.broadcast %149 : vector<8x1xf32> to vector<8x128xf32>
    %152 = arith.mulf %151, %150 : vector<8x128xf32>
    %153 = arith.addf %148, %152 : vector<8x128xf32>
    %154 = arith.addf %139, %153 : vector<8x128xf32>
    %155 = vector.broadcast %4 : vector<8x1xf32> to vector<8x128xf32>
    %156 = arith.addf %154, %155 : vector<8x128xf32>
    %157 = vector.shape_cast %156 : vector<8x128xf32> to vector<1x8x128xf32>
    %cst_96 = arith.constant dense<0.000000e+00> : vector<1xf32>
    %158 = vector.multi_reduction <add>, %157, %cst_96 [1, 2] : vector<1x8x128xf32> to vector<1xf32>
    %159 = vector.shape_cast %158 : vector<1xf32> to vector<1x1x1xf32>
    %160 = vector.extract %159[0, 0, 0] : f32 from vector<1x1x1xf32>
    %161 = arith.mulf %156, %156 : vector<8x128xf32>
    %162 = vector.shape_cast %161 : vector<8x128xf32> to vector<1x8x128xf32>
    %cst_97 = arith.constant dense<0.000000e+00> : vector<1xf32>
    %163 = vector.multi_reduction <add>, %162, %cst_97 [1, 2] : vector<1x8x128xf32> to vector<1xf32>
    %164 = vector.shape_cast %163 : vector<1xf32> to vector<1x1x1xf32>
    %165 = vector.extract %164[0, 0, 0] : f32 from vector<1x1x1xf32>
    %cst_98 = arith.constant 9.765625E-4 : f32
    %166 = arith.mulf %160, %cst_98 : f32
    %cst_99 = arith.constant 9.765625E-4 : f32
    %167 = arith.mulf %165, %cst_99 : f32
    %168 = arith.mulf %166, %166 : f32
    %169 = arith.subf %167, %168 : f32
    %cst_100 = arith.constant 0.000000e+00 : f32
    %170 = arith.maximumf %169, %cst_100 : f32
    %cst_101 = arith.constant 9.99999974E-6 : f32
    %171 = arith.addf %170, %cst_101 : f32
    %172 = math.rsqrt %171 : f32
    %173 = vector.broadcast %172 : f32 to vector<8x1xf32>
    %174 = arith.mulf %5, %173 : vector<8x1xf32>
    %175 = vector.broadcast %166 : f32 to vector<8x1xf32>
    %176 = arith.mulf %175, %174 : vector<8x1xf32>
    %177 = arith.subf %6, %176 : vector<8x1xf32>
    %178 = vector.broadcast %174 : vector<8x1xf32> to vector<8x128xf32>
    %179 = arith.mulf %156, %178 : vector<8x128xf32>
    %180 = vector.broadcast %177 : vector<8x1xf32> to vector<8x128xf32>
    %181 = arith.addf %179, %180 : vector<8x128xf32>
    %cst_102 = arith.constant 0.000000e+00 : f32
    %182 = vector.broadcast %cst_102 : f32 to vector<8x128xf32>
    %183 = arith.cmpf oge, %181, %182 : vector<8x128xf32>
    %184 = vector.broadcast %7 : vector<8x1xf32> to vector<8x128xf32>
    %185 = arith.mulf %184, %181 : vector<8x128xf32>
    %186 = arith.select %183, %181, %185 : vector<8x128xi1>, vector<8x128xf32>
    %c0_103 = arith.constant 0 : index
    %c0_104 = arith.constant 0 : index
    %187 = vector.load %arg4[%c0_103, %c0_104] : memref<8x8xf32, #tpu.memory_space<vmem>>, vector<8x1xf32>
    %188 = vector.extract_strided_slice %186 {offsets = [0, 0], sizes = [1, 128], strides = [1, 1]} : vector<8x128xf32> to vector<1x128xf32>
    %189 = vector.broadcast %187 : vector<8x1xf32> to vector<8x128xf32>
    %190 = vector.broadcast %188 : vector<1x128xf32> to vector<8x128xf32>
    %191 = arith.mulf %189, %190 : vector<8x128xf32>
    %c0_105 = arith.constant 0 : index
    %c1_106 = arith.constant 1 : index
    %192 = vector.load %arg4[%c0_105, %c1_106] : memref<8x8xf32, #tpu.memory_space<vmem>>, vector<8x1xf32>
    %193 = vector.extract_strided_slice %186 {offsets = [1, 0], sizes = [1, 128], strides = [1, 1]} : vector<8x128xf32> to vector<1x128xf32>
    %194 = vector.broadcast %192 : vector<8x1xf32> to vector<8x128xf32>
    %195 = vector.broadcast %193 : vector<1x128xf32> to vector<8x128xf32>
    %196 = arith.mulf %194, %195 : vector<8x128xf32>
    %197 = arith.addf %191, %196 : vector<8x128xf32>
    %c0_107 = arith.constant 0 : index
    %c2_108 = arith.constant 2 : index
    %198 = vector.load %arg4[%c0_107, %c2_108] : memref<8x8xf32, #tpu.memory_space<vmem>>, vector<8x1xf32>
    %199 = vector.extract_strided_slice %186 {offsets = [2, 0], sizes = [1, 128], strides = [1, 1]} : vector<8x128xf32> to vector<1x128xf32>
    %200 = vector.broadcast %198 : vector<8x1xf32> to vector<8x128xf32>
    %201 = vector.broadcast %199 : vector<1x128xf32> to vector<8x128xf32>
    %202 = arith.mulf %200, %201 : vector<8x128xf32>
    %203 = arith.addf %197, %202 : vector<8x128xf32>
    %c0_109 = arith.constant 0 : index
    %c3_110 = arith.constant 3 : index
    %204 = vector.load %arg4[%c0_109, %c3_110] : memref<8x8xf32, #tpu.memory_space<vmem>>, vector<8x1xf32>
    %205 = vector.extract_strided_slice %186 {offsets = [3, 0], sizes = [1, 128], strides = [1, 1]} : vector<8x128xf32> to vector<1x128xf32>
    %206 = vector.broadcast %204 : vector<8x1xf32> to vector<8x128xf32>
    %207 = vector.broadcast %205 : vector<1x128xf32> to vector<8x128xf32>
    %208 = arith.mulf %206, %207 : vector<8x128xf32>
    %209 = arith.addf %203, %208 : vector<8x128xf32>
    %c0_111 = arith.constant 0 : index
    %c4_112 = arith.constant 4 : index
    %210 = vector.load %arg4[%c0_111, %c4_112] : memref<8x8xf32, #tpu.memory_space<vmem>>, vector<8x1xf32>
    %211 = vector.extract_strided_slice %186 {offsets = [4, 0], sizes = [1, 128], strides = [1, 1]} : vector<8x128xf32> to vector<1x128xf32>
    %212 = vector.broadcast %210 : vector<8x1xf32> to vector<8x128xf32>
    %213 = vector.broadcast %211 : vector<1x128xf32> to vector<8x128xf32>
    %214 = arith.mulf %212, %213 : vector<8x128xf32>
    %215 = arith.addf %209, %214 : vector<8x128xf32>
    %c0_113 = arith.constant 0 : index
    %c5_114 = arith.constant 5 : index
    %216 = vector.load %arg4[%c0_113, %c5_114] : memref<8x8xf32, #tpu.memory_space<vmem>>, vector<8x1xf32>
    %217 = vector.extract_strided_slice %186 {offsets = [5, 0], sizes = [1, 128], strides = [1, 1]} : vector<8x128xf32> to vector<1x128xf32>
    %218 = vector.broadcast %216 : vector<8x1xf32> to vector<8x128xf32>
    %219 = vector.broadcast %217 : vector<1x128xf32> to vector<8x128xf32>
    %220 = arith.mulf %218, %219 : vector<8x128xf32>
    %221 = arith.addf %215, %220 : vector<8x128xf32>
    %c0_115 = arith.constant 0 : index
    %c6_116 = arith.constant 6 : index
    %222 = vector.load %arg4[%c0_115, %c6_116] : memref<8x8xf32, #tpu.memory_space<vmem>>, vector<8x1xf32>
    %223 = vector.extract_strided_slice %186 {offsets = [6, 0], sizes = [1, 128], strides = [1, 1]} : vector<8x128xf32> to vector<1x128xf32>
    %224 = vector.broadcast %222 : vector<8x1xf32> to vector<8x128xf32>
    %225 = vector.broadcast %223 : vector<1x128xf32> to vector<8x128xf32>
    %226 = arith.mulf %224, %225 : vector<8x128xf32>
    %227 = arith.addf %221, %226 : vector<8x128xf32>
    %c0_117 = arith.constant 0 : index
    %c7_118 = arith.constant 7 : index
    %228 = vector.load %arg4[%c0_117, %c7_118] : memref<8x8xf32, #tpu.memory_space<vmem>>, vector<8x1xf32>
    %229 = vector.extract_strided_slice %186 {offsets = [7, 0], sizes = [1, 128], strides = [1, 1]} : vector<8x128xf32> to vector<1x128xf32>
    %230 = vector.broadcast %228 : vector<8x1xf32> to vector<8x128xf32>
    %231 = vector.broadcast %229 : vector<1x128xf32> to vector<8x128xf32>
    %232 = arith.mulf %230, %231 : vector<8x128xf32>
    %233 = arith.addf %227, %232 : vector<8x128xf32>
    %234 = vector.broadcast %8 : vector<8x1xf32> to vector<8x128xf32>
    %235 = arith.addf %233, %234 : vector<8x128xf32>
    %c0_119 = arith.constant 0 : index
    %c0_120 = arith.constant 0 : index
    %c0_121 = arith.constant 0 : index
    %236 = vector.load %arg1[%c0_119, %c0_120, %c0_121] : memref<1x8x128xf32, #tpu.memory_space<vmem>>, vector<1x8x128xf32>
    %237 = vector.shape_cast %236 : vector<1x8x128xf32> to vector<8x128xf32>
    %238 = arith.addf %235, %237 : vector<8x128xf32>
    %c0_122 = arith.constant 0 : index
    %c0_123 = arith.constant 0 : index
    %c0_124 = arith.constant 0 : index
    %239 = vector.load %arg8[%c0_122, %c0_123, %c0_124] : memref<1x8x128xf32, #tpu.memory_space<vmem>>, vector<1x8x128xf32>
    %240 = vector.shape_cast %239 : vector<1x8x128xf32> to vector<8x128xf32>
    %241 = vector.shape_cast %238 : vector<8x128xf32> to vector<1x8x128xf32>
    tpu.vector_store %arg8[%c0_122, %c0_123, %c0_124], %241 {strides = array<i32>} : memref<1x8x128xf32, #tpu.memory_space<vmem>>, vector<1x8x128xf32>,
    return
  }
  func.func @transform_0(%arg0: i32) -> (i32, i32, i32) {
    %c0_i32 = arith.constant 0 : i32
    %c0_i32_0 = arith.constant 0 : i32
    %c0_i32_1 = arith.constant 0 : i32
    return %arg0, %c0_i32, %c0_i32_0 : i32, i32, i32
  }
  func.func @transform_1(%arg0: i32) -> (i32, i32, i32) {
    %c0_i32 = arith.constant 0 : i32
    %c0_i32_0 = arith.constant 0 : i32
    %c0_i32_1 = arith.constant 0 : i32
    return %arg0, %c0_i32, %c0_i32_0 : i32, i32, i32
  }
  func.func @transform_2(%arg0: i32) -> (i32, i32) {
    %c0_i32 = arith.constant 0 : i32
    %c0_i32_0 = arith.constant 0 : i32
    %c0_i32_1 = arith.constant 0 : i32
    return %c0_i32, %c0_i32_0 : i32, i32
  }
  func.func @transform_3(%arg0: i32) -> (i32, i32) {
    %c0_i32 = arith.constant 0 : i32
    %c0_i32_0 = arith.constant 0 : i32
    %c0_i32_1 = arith.constant 0 : i32
    return %c0_i32, %c0_i32_0 : i32, i32
  }
  func.func @transform_4(%arg0: i32) -> (i32, i32) {
    %c0_i32 = arith.constant 0 : i32
    %c0_i32_0 = arith.constant 0 : i32
    %c0_i32_1 = arith.constant 0 : i32
    return %c0_i32, %c0_i32_0 : i32, i32
  }
  func.func @transform_5(%arg0: i32) -> (i32, i32) {
    %c0_i32 = arith.constant 0 : i32
    %c0_i32_0 = arith.constant 0 : i32
    %c0_i32_1 = arith.constant 0 : i32
    return %c0_i32, %c0_i32_0 : i32, i32
  }
  func.func @transform_6(%arg0: i32) -> (i32, i32) {
    %c0_i32 = arith.constant 0 : i32
    %c0_i32_0 = arith.constant 0 : i32
    %c0_i32_1 = arith.constant 0 : i32
    return %c0_i32, %c0_i32_0 : i32, i32
  }
  func.func @transform_7(%arg0: i32) -> (i32, i32, i32) {
    %c0_i32 = arith.constant 0 : i32
    %c0_i32_0 = arith.constant 0 : i32
    %c0_i32_1 = arith.constant 0 : i32
    return %arg0, %c0_i32, %c0_i32_0 : i32, i32, i32
  }
}

</mosaic_0001>

<bundles_post_ra>
// kernel: tpu_custom_call.1
= control target key start
LH: loop header
LB: loop body
LE: loop exit
PB: predicated region body
PF: predicated region fallthrough
CT: control target
= control target key end

     0   :  { %s1697_s0 = inlined_call_operand.vmem [shape: f32[2,8,128], index: 0, kind: input, shape index: {}]   ;;  %s1698_s1 = inlined_call_operand.vmem [shape: f32[2,8,1], index: 1, kind: input, shape index: {}]   ;;  %s1699_s2 = inlined_call_operand.hbm [shape: f32[8,8], index: 2, kind: input, shape index: {}]   ;;  %s1700_s3 = inlined_call_operand.hbm [shape: f32[8,8], index: 3, kind: input, shape index: {}]   ;;  %s1701_s4 = inlined_call_operand.hbm [shape: f32[8,9], index: 4, kind: input, shape index: {}]   ;;  %s1702_s5 = inlined_call_operand.hbm [shape: f32[8,9], index: 5, kind: input, shape index: {}]   ;;  %s1703_s6 = inlined_call_operand.vmem [shape: f32[3,128], index: 6, kind: input, shape index: {}]   ;;  %s1704_s7 = inlined_call_operand.hbm [shape: f32[2,8,128], index: 7, kind: output, shape index: {}]  }
   0x1   :  { %1705 = sst [smem:[#allocation16_spill]] %s1699_s2 }
   0x2   :  { %12 = vsyncpa [#allocation4], 0 }
   0x3   :  { %13 = vsyncpa [#allocation7], 0 }
   0x4   :  { %14 = vsyncpa [#allocation10], 0 }
   0x5   :  { %15 = vsyncpa [#allocation5], 0 }
   0x6   :  { %17 = vsyncpa [#allocation5 + $0x1], 0  ;;  %s1424_s24 = smov 0   ;;  %s1426_s25 = smov 0  }
   0x7   :  { %s1428_s26 = smov 0   ;;  %s1430_s27 = smov 0  }
   0x8 LB: > { %s1445_s28 = sadd.s32 4294967295, %s1359_s27   ;;  %s985_s29 = sadd.s32 4294967294, %s1359_s27   ;;  %s1359_s27 = sphi %s1430_s27, %s1714_s27   ;;  %s1355_s26 = sphi %s1428_s26, %s1713_s26   ;;  %s1351_s25 = sphi %s1426_s25, %s1712_s25   ;;  %s1347_s24 = sphi %s1424_s24, %s1711_s24  }
   0x9   : > { %s1449_s30 = sadd.s32 1, %s1359_s27   ;;  %s187_s8 = sadd.s32 1, %s1355_s26 }
   0xa   : > { %s184_s9 = ssub.s32 %s1359_s27, %s1449_s30  ;;  %p197_p0 = scmp.ne.s32.totalorder %s1355_s26, %s1351_s25 }
   0xb   : > { %p185_p1 = scmp.eq.s32.totalorder %s184_s9, 0  ;;  %p198_p2 = scmp.eq.s32.totalorder %s1445_s28, 1 }
   0xc   : > { %p203_p3 = scmp.ne.s32.totalorder %s1351_s25, %s1347_s24  ;;  %p204_p4 = scmp.eq.s32.totalorder %s985_s29, 1 }
   0xd   : > { %s1460_s10 = scalar_select %p185_p1, %s1355_s26, %s187_s8  }
   0xe   : > { %p1462_p5 = por %p198_p2, %p197_p0  ;;  %p1466_p6 = por %p204_p4, %p203_p3 }
   0xf   : > { %p986_p7 = scmp.ge.s32.totalorder %s1359_s27, 1  ;;  %p211_p8 = scmp.lt.s32.totalorder %s1359_s27, 3 }
  0x10   : > { %p1051_p9 = scmp.eq.s32.totalorder %s1445_s28, 0  ;;  %s235_s16 = sshll.u32 %s1700_s3, 4  ;;  %s236_s16 = int_to_ptr.hbm [resolvable:$true] %s235_s16 }
  0x11   : > { %p1473_p10 = pnand %p986_p7, %p211_p8  ;;  %s1361_s17 = smov [#allocation6]  }
  0x12   : > { %s237_s18 = sshll.u32 %s1361_s17, 4  ;;  %s1709_s2 = sld [smem:[#allocation16_spill]]  ;;  %s238_s18 = int_to_ptr.vmem [resolvable:$true] %s237_s18 }
  0x13   : > { %p1034_p11 = pneg %p1473_p10  ;;  %s247_s8 = sshll.u32 %s1701_s4, 4  ;;  %s248_s8 = int_to_ptr.hbm [resolvable:$true] %s247_s8 }
  0x14   : > { %s1362_s9 = smov [#allocation3]   ;;  %s259_s19 = sshll.u32 %s1702_s5, 4  ;;  %s260_s19 = int_to_ptr.hbm [resolvable:$true] %s259_s19 }
  0x15   : > { %p1487_p12 = pnand %p1051_p9, %p1034_p11  ;;  %s225_s14 = sshll.u32 %s1362_s9, 4  ;;  %s226_s14 = int_to_ptr.vmem [resolvable:$true] %s225_s14 }
  0x16   : > { %s1363_s20 = smov [#allocation8]   ;;  %s1364_s23 = smov [#allocation9]  }
  0x17   : > { %1040 = dma.hbm_to_vmem [thread:$0]  (!%p1487_p12), %s236_s16, 128, %s238_s18, [#allocation7]  }
  0x18   : > { %s223_s21 = sshll.u32 %s1709_s2, 4  ;;  %s249_s2 = sshll.u32 %s1363_s20, 4  ;;  %s224_s21 = int_to_ptr.hbm [resolvable:$true] %s223_s21  ;;  %s250_s2 = int_to_ptr.vmem [resolvable:$true] %s249_s2 }
  0x19   : > { %1037 = dma.hbm_to_vmem [thread:$0]  (!%p1487_p12), %s224_s21, 128, %s226_s14, [#allocation4]  }
  0x1a   : > { %1043 = dma.hbm_to_vmem [thread:$0]  (!%p1487_p12), %s248_s8, 128, %s250_s2, [#allocation7]  }
  0x1b   : > { %s261_s29 = sshll.u32 %s1364_s23, 4  ;;  %291 = sbr.rel (%p1473_p10) target bundleno = 1693 (0x69d), region = 48  ;;  %s262_s29 = int_to_ptr.vmem [resolvable:$true] %s261_s29 }
  0x1c   : > { %1046 = dma.hbm_to_vmem [thread:$0]  (!%p1487_p12), %s260_s19, 128, %s262_s29, [#allocation10]  }
  0x20   : > { %1330 = dma.done.wait (%p1051_p9), [#allocation4], 128  }
  0x21   : > { %1332 = vsyncadd (%p1051_p9), [#allocation4], 4294967168 }
  0x22   : > { %1334 = dma.done.wait (%p1051_p9), [#allocation7], 256  }
  0x23   : > { %1336 = vsyncadd (%p1051_p9), [#allocation7], 4294967040 }
  0x24   : > { %1338 = dma.done.wait (%p1051_p9), [#allocation10], 128  }
  0x25   : > { %1340 = vsyncadd (%p1051_p9), [#allocation10], 4294967168  ;;  %v1365_v0 = vmov 0   ;;  %v1366_v1 = vmov 2   ;;  %p342_p13 = scmp.lt.s32.totalorder %s1445_s28, 1  ;;  %v1367_v2 = vmov 4  }
  0x26   : > { %1115 = vset.pattern.permute.xlu0 %v1365_v0  ;;  %1117 = vset.pattern.permute.xlu1 %v1366_v1  ;;  %v351_v3 = vld [vmem:[#allocation3] sm:$0xff]  ;;  %v1368_v4 = vmov 1   ;;  %v1369_v5 = vmov 3   ;;  %v1370_v6 = vmov 5   ;;  %v1537_v7 = vld [vmem:[#allocation9] sm:$0xff]  ;;  %v1371_v8 = vmov 6  }
  0x27   : > { %1119 = vset.pattern.permute.xlu2 %v1367_v2  ;;  %s1524_s2 = scalar_select %p342_p13, %s1445_s28, 1  ;;  %355 = vperm.xlu0 %1115, %v351_v3   ;;  %v1372_v9 = vmov 7   ;;  %vm496_vm3 = vcmask 130048   ;;  %vm494_vm4 = vcmask 1048432   ;;  %vm521_vm6 = vcmask 916480  }
  0x28   : > { %370 = vperm.xlu1 %1117, %v351_v3   ;;  %386 = vperm.xlu2 %1119, %v351_v3   ;;  %s1373_s19 = smov 0.0   ;;  %vm541_vm7 = vcmask 785408   ;;  %s1381_s29 = smov 126   ;;  %vm609_vm8 = vcmask 1039360   ;;  %vm655_vm9 = vcmask 1031168   ;;  %vm673_vm10 = vcmask 146432  }
  0x29   : > { %s998_s13 = sshll.u32 %s1524_s2, 3  ;;  %s1377_s2 = smov 96  }
  0x2a   : > { %s1532_s21 = scalar_lea.vmem %s1697_s0, %s998_s13  ;;  %s349_s18 = scalar_lea.vmem %s1698_s1, %s998_s13 }
  0x2b   : > { %v1151_v13 = vld [vmem:[%s1532_s21] ss:$0 sm:$0xff]  ;;  %v1154_v14 = vld [vmem:[%s1532_s21 + $0x1] ss:$0 sm:$0xff]  ;;  %v1152_v16 = vld [vmem:[%s1532_s21 + $0x2] ss:$0 sm:$0xff] }
  0x2c   : > { %v1155_v21 = vld [vmem:[%s1532_s21 + $0x3] ss:$0 sm:$0xff]  ;;  %v1153_v23 = vld [vmem:[%s1532_s21 + $0x4] ss:$0 sm:$0xff]  ;;  %v1156_v27 = vld [vmem:[%s1532_s21 + $0x5] ss:$0 sm:$0xff] }
  0x2d   : > { %v1157_v28 = vld [vmem:[%s1532_s21 + $0x6] ss:$0 sm:$0xff]  ;;  %v1158_v31 = vld [vmem:[%s1532_s21 + $0x7] ss:$0 sm:$0xff]  ;;  %s1382_s16 = smov 127  }
  0x2f   : > { %1116 = vset.pattern.permute.xlu0 %v1368_v4 }
  0x30   : > { %1118 = vset.pattern.permute.xlu1 %v1369_v5  ;;  %362 = vperm.xlu0 %1116, %v351_v3  }
  0x31   : > { %378 = vperm.xlu1 %1118, %v351_v3   ;;  %1120 = vset.pattern.permute.xlu2 %v1370_v6 }
  0x32   : > { %394 = vperm.xlu2 %1120, %v351_v3  }
  0x38   : > { %1123 = vset.pattern.permute.xlu0 %v1365_v0 }
  0x39   : > { %1121 = vset.pattern.permute.xlu1 %v1371_v8  ;;  %418 = vperm.xlu0 %1123, %v1537_v7  }
  0x3a   : > { %402 = vperm.xlu1 %1121, %v351_v3   ;;  %1122 = vset.pattern.permute.xlu2 %v1372_v9 }
  0x3b   : > { %410 = vperm.xlu2 %1122, %v351_v3  }
  0x41   : > { %1124 = vset.pattern.permute.xlu0 %v1368_v4 }
  0x42   : > { %1126 = vset.pattern.permute.xlu1 %v1365_v0 }
  0x43   : > { %1125 = vset.pattern.permute.xlu2 %v1369_v5 }
  0x82   : > { %v387_v10 = vpop.permute.xlu2 %386 }
  0x83   : > { %v390_v29 = vmul.f32 %v1153_v23, %v387_v10 }
  0x8c   : > { %v395_v15 = vpop.permute.xlu2 %394 }
  0x8d   : > { %v398_v34 = vmul.f32 %v1156_v27, %v395_v15 }
  0x95   : > { %v411_v32 = vpop.permute.xlu2 %410 }
  0x96   : > { %v414_v38 = vmul.f32 %v1158_v31, %v411_v32 }
  0x99   : > { %v356_v11 = vpop.permute.xlu0 %355 }
  0x9a   : > { %v371_v12 = vpop.permute.xlu1 %370  ;;  %v359_v19 = vmul.f32 %v1151_v13, %v356_v11  ;;  %v487_v11 = vld [vmem:[%s349_s18] sm:$0xff]  ;;  %s1383_s18 = smov 18  }
  0x9b   : > { %v374_v22 = vmul.f32 %v1152_v16, %v371_v12  ;;  %v499_v16 = vld [vmem:[#allocation8] sm:$0xff] }
  0xa2   : > { %v363_v17 = vpop.permute.xlu0 %362 }
  0xa3   : > { %v379_v18 = vpop.permute.xlu1 %378  ;;  %v366_v20 = vmul.f32 %v1154_v14, %v363_v17  ;;  %v1375_v17 = vmov 0.0  }
  0xa4   : > { %v382_v26 = vmul.f32 %v1155_v21, %v379_v18  ;;  %497 = vst.msk [vmem:[#allocation2 + $0x10] sm:$0xff] %vm496_vm3, %v1375_v17 }
  0xa5   : > { %v367_v24 = vadd.f32 %v366_v20, %v359_v19  ;;  %v1376_v20 = vmov 8   ;;  %495 = vst.msk [vmem:[#allocation2] sm:$0xff] %vm494_vm4, %v1375_v17 }
  0xa7   : > { %v375_v25 = vadd.f32 %v374_v22, %v367_v24 }
  0xa9   : > { %v383_v30 = vadd.f32 %v382_v26, %v375_v25  ;;  %v1159_v25 = vld [vmem:[%s1703_s6 + $0x1] ss:$0 sm:$0xff] }
  0xab   : > { %v391_v33 = vadd.f32 %v390_v29, %v383_v30  ;;  %v419_v40 = vpop.permute.xlu0 %418  ;;  %v528_v22 = vld [vmem:[#allocation2 + $0x10] sm:$0xff] }
  0xac   : > { %v403_v35 = vpop.permute.xlu1 %402 }
  0xad   : > { %v406_v36 = vmul.f32 %v1157_v28, %v403_v35  ;;  %v399_v37 = vadd.f32 %v398_v34, %v391_v33  ;;  %v1587_v35 = vld [vmem:[#allocation2] sm:$0xff] }
  0xaf   : > { %v407_v39 = vadd.f32 %v406_v36, %v399_v37 }
  0xb1   : > { %v415_v41 = vadd.f32 %v414_v38, %v407_v39 }
  0xb3   : > { %v1554_v42 = vadd.f32 %v419_v40, %v415_v41 }
  0xb5   : > { %422 = vadd.xlane.f32.xlu1 %v1554_v42  ;;  %v431_v43 = vmul.f32 %v1554_v42, %v1554_v42 }
  0xb7   : > { %432 = vadd.xlane.f32.xlu2 %v431_v43 }
  0xce   : > { %490 = vperm.xlu1 %1126, %v487_v11  }
  0xcf   : > { %482 = vperm.xlu2 %1125, %v1537_v7  }
  0xd6   : > { %1130 = vset.pattern.permute.xlu1 %v1370_v6 }
  0xd7   : > { %1129 = vset.pattern.permute.xlu2 %v1372_v9  ;;  %622 = vperm.xlu1 %1130, %v499_v16  }
  0xd8   : > { %579 = vperm.xlu2 %1129, %v499_v16  }
  0xdf   : > { %1133 = vset.pattern.permute.xlu1 %v1368_v4 }
  0xe0   : > { %1132 = vset.pattern.permute.xlu2 %v1369_v5  ;;  %556 = vperm.xlu1 %1133, %v499_v16  }
  0xe1   : > { %510 = vperm.xlu2 %1132, %v499_v16  }
  0xe8   : > { %1137 = vset.pattern.permute.xlu1 %v1367_v2 }
  0xe9   : > { %1135 = vset.pattern.permute.xlu2 %v1366_v1 }
 0x128   : > { %v423_v44 = vpop.xlane.xlu1 %422 }
 0x129   : > { %v424_v45 = vrot.slane %v423_v44, 4 }
 0x12a   : > { %v433_v46 = vpop.xlane.xlu2 %432 }
 0x12b   : > { %v425_v47 = vadd.f32 %v424_v45, %v423_v44  ;;  %v434_v48 = vrot.slane %v433_v46, 4 }
 0x12d   : > { %v426_v49 = vrot.slane %v425_v47, 2  ;;  %v435_v50 = vadd.f32 %v434_v48, %v433_v46 }
 0x12f   : > { %v436_v51 = vrot.slane %v435_v50, 2  ;;  %v427_v52 = vadd.f32 %v426_v49, %v425_v47 }
 0x131   : > { %v428_v53 = vrot.slane %v427_v52, 1  ;;  %v437_v54 = vadd.f32 %v436_v51, %v435_v50 }
 0x132   : > { %v483_v21 = vpop.permute.xlu2 %482 }
 0x133   : > { %v429_v55 = vadd.f32 %v428_v53, %v427_v52  ;;  %v438_v56 = vrot.slane %v437_v54, 1 }
 0x135   : > { %1004 = vpush %v429_v55  ;;  %v439_v57 = vadd.f32 %v438_v56, %v437_v54 }
 0x137   : > { %1006 = vpush %v439_v57 }
 0x13a   : > { %v580_v23 = vpop.permute.xlu2 %579 }
 0x13b   : > { %v583_v24 = vmul.f32 %v580_v23, %v528_v22 }
 0x13d   : > { %588 = vrot.lane.b32.xlu1 %v583_v24, %s1377_s2 }
 0x140   : > { %v491_v27 = vpop.permute.xlu1 %490 }
 0x142   : > { %v511_v46 = vpop.permute.xlu2 %510 }
 0x143   : > { %v513_v49 = vmul.f32 %v511_v46, %v1587_v35 }
 0x149   : > { %v623_v34 = vpop.permute.xlu1 %622 }
 0x152   : > { %v557_v51 = vpop.permute.xlu1 %556 }
 0x166   : > { %s1005_s22 = spop %1004 }
 0x167   : > { %s441_s8 = smul.f32 0.0009765625, %s1005_s22 }
 0x168   : > { %s1007_s9 = spop %1006 }
 0x169   : > { %s443_s14 = smul.f32 %s441_s8, %s441_s8  ;;  %v461_v14 = vstv %s441_s8 }
 0x16a   : > { %s442_s15 = smul.f32 0.0009765625, %s1007_s9  ;;  %s1374_s9 = smov 1  }
 0x16c   : > { %s444_s17 = ssub.f32 %s442_s15, %s443_s14  ;;  %s1378_s14 = smov 111  }
 0x16d   : > { %598 = vrot.lane.b32.xlu1 %v1159_v25, %s1378_s14  ;;  %s1379_s15 = smov 112  }
 0x16e   : > { %s445_s20 = smax.f32 %s1373_s19, %s444_s17 }
 0x16f   : > { %s446_s23 = sadd.f32 1e-05, %s445_s20 }
 0x171   : > { %v447_v58 = vstv %s446_s23  ;;  %s1380_s23 = smov 110  }
 0x172   : > { %1161 = vrsqrt.f32 %v447_v58  ;;  %vm454_vm1 = vweird.f32 %v447_v58 }
 0x178   : > { %v1162_v59 = vpop.eup %1161 }
 0x179   : > { %v449_v60 = vmul.f32 %v1162_v59, %v447_v58  ;;  %vm455_vm0 = vweird.f32 %v1162_v59 }
 0x17a   : > { %vm456_vm2 = vmor %vm454_vm1, %vm455_vm0 }
 0x17b   : > { %v450_v61 = vmul.f32 %v1162_v59, %v449_v60 }
 0x17d   : > { %v451_v62 = vmul.f32 0.5, %v450_v61  ;;  %v559_v61 = vmul.f32 %v557_v51, %v1587_v35 }
 0x17f   : > { %v452_v63 = vsub.f32 1.5, %v451_v62 }
 0x181   : > { %v453_v3 = vmul.f32 %v1162_v59, %v452_v63 }
 0x183   : > { %v457_v10 = vsel %vm456_vm2, %v1162_v59, %v453_v3 }
 0x184   : > { %1008 = vpush %v457_v10 }
 0x1af   : > { %v589_v53 = vpop.permute.xlu1 %588 }
 0x1b5   : > { %s1009_s22 = spop %1008 }
 0x1b6   : > { %v459_v12 = vstv %s1009_s22 }
 0x1b7   : > { %v460_v13 = vmul.f32 %v459_v12, %v1537_v7 }
 0x1b9   : > { %v462_v15 = vmul.f32 %v461_v14, %v460_v13 }
 0x1bb   : > { %464 = vrot.lane.b32.xlu0 %v462_v15, %s1374_s9 }
 0x1c3   : > { %470 = vperm.xlu0 %1124, %v460_v13  }
 0x1cb   : > { %1127 = vset.pattern.permute.xlu0 %v1366_v1 }
 0x1df   : > { %v599_v55 = vpop.permute.xlu1 %598 }
 0x22d   : > { %v465_v18 = vpop.permute.xlu0 %464 }
 0x22e   : > { %v467_v19 = vsub.f32 %v1537_v7, %v465_v18 }
 0x230   : > { %476 = vperm.xlu0 %1127, %v467_v19  }
 0x235   : > { %v471_v26 = vpop.permute.xlu0 %470 }
 0x236   : > { %v473_v28 = vmul.f32 %v471_v26, %v1554_v42  ;;  %v1160_v42 = vld [vmem:[%s1703_s6] ss:$0 sm:$0xff] }
 0x238   : > { %1128 = vset.pattern.permute.xlu0 %v1367_v2 }
 0x239   : > { %562 = vperm.xlu0 %1128, %v499_v16  }
 0x241   : > { %1131 = vset.pattern.permute.xlu0 %v1376_v20 }
 0x242   : > { %633 = vperm.xlu0 %1131, %v499_v16  }
 0x24a   : > { %1134 = vset.pattern.permute.xlu0 %v1371_v8 }
 0x24b   : > { %530 = vperm.xlu0 %1134, %v499_v16  }
 0x253   : > { %1136 = vset.pattern.permute.xlu0 %v1365_v0 }
 0x2a2   : > { %v477_v29 = vpop.permute.xlu0 %476 }
 0x2a3   : > { %v479_v30 = vadd.f32 %v477_v29, %v473_v28 }
 0x2a5   : > { %vm480_vm5 = vcmp.ge.f32.partialorder %v479_v30, 0.0  ;;  %v485_v31 = vmul.f32 %v483_v21, %v479_v30 }
 0x2a7   : > { %v486_v32 = vsel %vm480_vm5, %v479_v30, %v485_v31 }
 0x2a8   : > { %v1585_v33 = vadd.f32 %v491_v27, %v486_v32 }
 0x2aa   : > { %v625_v36 = vmul.f32 %v623_v34, %v1585_v33  ;;  %v582_v43 = vmul.f32 %v580_v23, %v1585_v33  ;;  %v514_v48 = vmul.f32 %v511_v46, %v1585_v33  ;;  %v560_v59 = vmul.f32 %v557_v51, %v1585_v33 }
 0x2ab   : > { %v563_v37 = vpop.permute.xlu0 %562 }
 0x2ac   : > { %v565_v38 = vmul.f32 %v563_v37, %v1587_v35  ;;  %v566_v39 = vmul.f32 %v563_v37, %v1585_v33  ;;  %627 = vrot.lane.b32.xlu0 %v625_v36, %s1379_s15 }
 0x2ae   : > { %569 = vrot.lane.b32.xlu2 %v565_v38, %s1379_s15  ;;  %571 = vrot.lane.b32.xlu1 %v566_v39, %s1379_s15 }
 0x2b4   : > { %v634_v40 = vpop.permute.xlu0 %633  ;;  %504 = vperm.xlu0 %1136, %v499_v16  }
 0x2b5   : > { %v637_v41 = vmul.f32 %v634_v40, %v528_v22  ;;  %v636_v47 = vmul.f32 %v634_v40, %v1585_v33 }
 0x2b6   : > { %616 = vperm.xlu2 %1135, %v499_v16  }
 0x2b7   : > { %642 = vrot.lane.b32.xlu1 %v637_v41, %s1377_s2 }
 0x2bc   : > { %550 = vrot.lane.b32.xlu0 %v1160_v42, %s1380_s23 }
 0x2bd   : > { %v531_v44 = vpop.permute.xlu0 %530  ;;  %1138 = vset.pattern.permute.xlu0 %v1370_v6 }
 0x2be   : > { %v534_v45 = vmul.f32 %v531_v44, %v528_v22  ;;  %586 = vrot.lane.b32.xlu2 %v582_v43, %s1377_s2  ;;  %v533_v50 = vmul.f32 %v531_v44, %v1585_v33 }
 0x2bf   : > { %1139 = vset.pattern.permute.xlu2 %v1372_v9 }
 0x2c0   : > { %539 = vrot.lane.b32.xlu1 %v534_v45, %s1377_s2 }
 0x2c6   : > { %640 = vrot.lane.b32.xlu2 %v636_v47, %s1377_s2 }
 0x2c8   : > { %519 = vrot.lane.b32.xlu1 %v514_v48, %s1379_s15 }
 0x2ce   : > { %517 = vrot.lane.b32.xlu2 %v513_v49, %s1379_s15 }
 0x2d6   : > { %537 = vrot.lane.b32.xlu2 %v533_v50, %s1377_s2 }
 0x308   : > { %v570_v52 = vpop.permute.xlu2 %569 }
 0x310   : > { %v617_v54 = vpop.permute.xlu2 %616 }
 0x311   : > { %v619_v57 = vmul.f32 %v617_v54, %v1587_v35  ;;  %v620_v19 = vmul.f32 %v617_v54, %v1585_v33 }
 0x318   : > { %v587_v56 = vpop.permute.xlu2 %586 }
 0x319   : > { %v590_v12 = vsel %vm541_vm7, %v587_v56, %v589_v53 }
 0x31e   : > { %v628_v58 = vpop.permute.xlu0 %627 }
 0x31f   : > { %v630_v60 = vadd.f32 %v628_v58, %v619_v57  ;;  %v631_v22 = vadd.f32 %v628_v58, %v620_v19 }
 0x320   : > { %v641_v62 = vpop.permute.xlu2 %640  ;;  %v572_v63 = vpop.permute.xlu1 %571 }
 0x321   : > { %v647_v3 = vadd.f32 %v641_v62, %v630_v60  ;;  %v573_v10 = vsel %vm521_vm6, %v570_v52, %v572_v63  ;;  %v577_v11 = vadd.f32 %v572_v63, %v560_v59 }
 0x322   : > { %v576_v13 = vadd.f32 %v573_v10, %v559_v61 }
 0x323   : > { %v594_v14 = vadd.f32 %v590_v12, %v577_v11  ;;  %651 = vrot.lane.b32.xlu0 %v647_v3, %s1381_s29 }
 0x324   : > { %v593_v15 = vadd.f32 %v587_v56, %v576_v13 }
 0x325   : > { %v602_v16 = vmul.f32 %v599_v55, %v594_v14 }
 0x326   : > { %v601_v17 = vmul.f32 %v599_v55, %v593_v15  ;;  %v505_v26 = vpop.permute.xlu0 %504 }
 0x327   : > { %607 = vrot.lane.b32.xlu1 %v602_v16, %s1382_s16  ;;  %v507_v29 = vmul.f32 %v505_v26, %v1587_v35  ;;  %v508_v31 = vmul.f32 %v505_v26, %v1585_v33 }
 0x328   : > { %605 = vrot.lane.b32.xlu2 %v601_v17, %s1382_s16  ;;  %v518_v24 = vpop.permute.xlu2 %517 }
 0x329   : > { %v643_v18 = vpop.permute.xlu1 %642 }
 0x32a   : > { %v644_v21 = vsel %vm541_vm7, %v641_v62, %v643_v18 }
 0x32b   : > { %v648_v23 = vadd.f32 %v644_v21, %v631_v22 }
 0x32e   : > { %v551_v36 = vpop.permute.xlu0 %550 }
 0x32f   : > { %662 = vperm.xlu1 %1137, %v1537_v7  }
 0x330   : > { %653 = vrot.lane.b32.xlu2 %v648_v23, %s1381_s29  ;;  %v538_v27 = vpop.permute.xlu2 %537 }
 0x332   : > { %v540_v25 = vpop.permute.xlu1 %539 }
 0x333   : > { %v542_v38 = vsel %vm541_vm7, %v538_v27, %v540_v25 }
 0x337   : > { %1140 = vset.pattern.permute.xlu1 %v1365_v0 }
 0x33a   : > { %v520_v28 = vpop.permute.xlu1 %519 }
 0x33b   : > { %v522_v30 = vsel %vm521_vm6, %v518_v24, %v520_v28  ;;  %v526_v34 = vadd.f32 %v520_v28, %v508_v31 }
 0x33c   : > { %v525_v32 = vadd.f32 %v522_v30, %v507_v29 }
 0x33d   : > { %v546_v40 = vadd.f32 %v542_v38, %v526_v34 }
 0x33e   : > { %v545_v39 = vadd.f32 %v538_v27, %v525_v32  ;;  %v755_v27 = vld [vmem:[#allocation6] sm:$0xff] }
 0x33f   : > { %v554_v42 = vmul.f32 %v551_v36, %v546_v40 }
 0x340   : > { %v553_v41 = vmul.f32 %v551_v36, %v545_v39 }
 0x382   : > { %v606_v37 = vpop.permute.xlu2 %605 }
 0x38a   : > { %v654_v46 = vpop.permute.xlu2 %653 }
 0x395   : > { %v652_v44 = vpop.permute.xlu0 %651 }
 0x396   : > { %v656_v47 = vsel %vm655_vm9, %v652_v44, %v654_v46 }
 0x399   : > { %v608_v0 = vpop.permute.xlu1 %607 }
 0x39a   : > { %v610_v43 = vsel %vm609_vm8, %v606_v37, %v608_v0  ;;  %v614_v45 = vadd.f32 %v608_v0, %v554_v42 }
 0x39b   : > { %v613_v35 = vadd.f32 %v610_v43, %v553_v41 }
 0x39c   : > { %v660_v48 = vadd.f32 %v654_v46, %v614_v45 }
 0x39d   : > { %v659_v33 = vadd.f32 %v656_v47, %v613_v35 }
 0x3a1   : > { %v663_v49 = vpop.permute.xlu1 %662 }
 0x3a2   : > { %v1621_v50 = vadd.f32 %v663_v49, %v659_v33  ;;  %v1623_v51 = vadd.f32 %v663_v49, %v660_v48 }
 0x3a4   : > { %671 = vrot.lane.b32.xlu2 %v1623_v51, %s1383_s18  ;;  %669 = vrot.lane.b32.xlu0 %v1621_v50, %s1383_s18  ;;  %v685_v52 = vmul.f32 %v1621_v50, %v1621_v50  ;;  %v686_v53 = vmul.f32 %v1623_v51, %v1623_v51 }
 0x3a6   : > { %689 = vrot.lane.b32.xlu1 %v685_v52, %s1383_s18 }
 0x3ac   : > { %691 = vrot.lane.b32.xlu0 %v686_v53, %s1383_s18 }
 0x3fe   : > { %v672_v54 = vpop.permute.xlu2 %671 }
 0x416   : > { %v670_v55 = vpop.permute.xlu0 %669 }
 0x417   : > { %v674_v56 = vsel %vm673_vm10, %v670_v55, %v672_v54 }
 0x418   : > { %676 = vadd.xlane.f32.xlu2 %v674_v56  ;;  %v690_v57 = vpop.permute.xlu1 %689 }
 0x41e   : > { %v692_v58 = vpop.permute.xlu0 %691 }
 0x41f   : > { %v693_v59 = vsel %vm673_vm10, %v690_v57, %v692_v58 }
 0x420   : > { %695 = vadd.xlane.f32.xlu1 %v693_v59 }
 0x430   : > { %748 = vperm.xlu2 %1139, %v1537_v7  }
 0x438   : > { %1144 = vset.pattern.permute.xlu2 %v1369_v5 }
 0x439   : > { %758 = vperm.xlu1 %1140, %v755_v27   ;;  %786 = vperm.xlu2 %1144, %v755_v27  }
 0x441   : > { %1145 = vset.pattern.permute.xlu1 %v1367_v2  ;;  %1146 = vset.pattern.permute.xlu2 %v1370_v6  ;;  %v841_v2 = vld [vmem:[%s1532_s21] sm:$0xff]  ;;  %s339_s21 = sand.u32 1, %s1351_s25  }
 0x442   : > { %796 = vperm.xlu1 %1145, %v755_v27   ;;  %806 = vperm.xlu2 %1146, %v755_v27  }
 0x44a   : > { %1147 = vset.pattern.permute.xlu1 %v1371_v8  ;;  %1149 = vset.pattern.permute.xlu2 %v1376_v20 }
 0x44b   : > { %816 = vperm.xlu1 %1147, %v755_v27   ;;  %836 = vperm.xlu2 %1149, %v1537_v7  }
 0x453   : > { %843 = vrot.lane.b32.xlu1 %v841_v2, %s1380_s23  ;;  %s1001_s23 = sshll.u32 %s1445_s28, 3 }
 0x48b   : > { %v677_v60 = vpop.xlane.xlu2 %676 }
 0x48c   : > { %v678_v61 = vrot.slane %v677_v60, 4 }
 0x48e   : > { %v679_v62 = vadd.f32 %v678_v61, %v677_v60 }
 0x490   : > { %v680_v63 = vrot.slane %v679_v62, 2 }
 0x492   : > { %v681_v3 = vadd.f32 %v680_v63, %v679_v62 }
 0x493   : > { %v696_v10 = vpop.xlane.xlu1 %695  ;;  %v749_v36 = vpop.permute.xlu2 %748 }
 0x494   : > { %v697_v11 = vrot.slane %v696_v10, 4  ;;  %v682_v12 = vrot.slane %v681_v3, 1 }
 0x496   : > { %v698_v13 = vadd.f32 %v697_v11, %v696_v10  ;;  %v683_v14 = vadd.f32 %v682_v12, %v681_v3 }
 0x498   : > { %v699_v15 = vrot.slane %v698_v13, 2  ;;  %1010 = vpush %v683_v14 }
 0x49a   : > { %v700_v16 = vadd.f32 %v699_v15, %v698_v13 }
 0x49b   : > { %v787_v41 = vpop.permute.xlu2 %786 }
 0x49c   : > { %v701_v17 = vrot.slane %v700_v16, 1 }
 0x49e   : > { %v702_v18 = vadd.f32 %v701_v17, %v700_v16 }
 0x4a0   : > { %1012 = vpush %v702_v18 }
 0x4a3   : > { %v807_v62 = vpop.permute.xlu2 %806 }
 0x4ab   : > { %v759_v37 = vpop.permute.xlu1 %758 }
 0x4b4   : > { %v797_v43 = vpop.permute.xlu1 %796 }
 0x4bd   : > { %v817_v14 = vpop.permute.xlu1 %816 }
 0x4c9   : > { %s1011_s22 = spop %1010 }
 0x4ca   : > { %s1639_s2 = smul.f32 0.0009765625, %s1011_s22  ;;  %s868_s22 = scalar_lea.hbm %s1704_s7, %s1001_s23 }
 0x4cc   : > { %s706_s13 = smul.f32 %s1639_s2, %s1639_s2  ;;  %v724_v30 = vstv %s1639_s2 }
 0x4d1   : > { %s1013_s8 = spop %1012 }
 0x4d2   : > { %s705_s14 = smul.f32 0.0009765625, %s1013_s8  ;;  %s872_s8 = sshll.u32 %s868_s22, 4  ;;  %s873_s8 = int_to_ptr.hbm [resolvable:$true] %s872_s8 }
 0x4d4   : > { %s707_s15 = ssub.f32 %s705_s14, %s706_s13  ;;  %s858_s14 = scalar_lea.sflag [#allocation5], %s339_s21 }
 0x4d6   : > { %s708_s17 = smax.f32 %s1373_s19, %s707_s15 }
 0x4d7   : > { %s709_s20 = sadd.f32 1e-05, %s708_s17 }
 0x4d9   : > { %v710_v5 = vstv %s709_s20  ;;  %s1305_s20 = scalar_lea.hbm %s1704_s7, 16 }
 0x4da   : > { %1163 = vrsqrt.f32 %v710_v5  ;;  %vm717_vm12 = vweird.f32 %v710_v5 }
 0x4e0   : > { %v1164_v19 = vpop.eup %1163 }
 0x4e1   : > { %v712_v21 = vmul.f32 %v1164_v19, %v710_v5  ;;  %vm718_vm11 = vweird.f32 %v1164_v19 }
 0x4e2   : > { %vm719_vm13 = vmor %vm717_vm12, %vm718_vm11 }
 0x4e3   : > { %v713_v22 = vmul.f32 %v1164_v19, %v712_v21 }
 0x4e5   : > { %v714_v23 = vmul.f32 0.5, %v713_v22 }
 0x4e7   : > { %v715_v24 = vsub.f32 1.5, %v714_v23 }
 0x4e9   : > { %v716_v25 = vmul.f32 %v1164_v19, %v715_v24 }
 0x4eb   : > { %v720_v26 = vsel %vm719_vm13, %v1164_v19, %v716_v25 }
 0x4ec   : > { %1014 = vpush %v720_v26 }
 0x51d   : > { %s1015_s19 = spop %1014 }
 0x51e   : > { %v722_v28 = vstv %s1015_s19 }
 0x51f   : > { %v723_v29 = vmul.f32 %v722_v28, %v1537_v7 }
 0x521   : > { %v725_v31 = vmul.f32 %v724_v30, %v723_v29 }
 0x523   : > { %727 = vrot.lane.b32.xlu0 %v725_v31, %s1374_s9  ;;  %s997_s9 = sshll.u32 %s339_s21, 3 }
 0x524   : > { %s341_s2 = scalar_lea.vmem [#allocation11], %s997_s9 }
 0x525   : > { %s870_s13 = sshll.u32 %s341_s2, 4  ;;  %s871_s13 = int_to_ptr.vmem [resolvable:$true] %s870_s13 }
 0x52b   : > { %733 = vperm.xlu0 %1138, %v723_v29  }
 0x533   : > { %1141 = vset.pattern.permute.xlu0 %v1368_v4 }
 0x534   : > { %766 = vperm.xlu0 %1141, %v755_v27  }
 0x53c   : > { %1142 = vset.pattern.permute.xlu0 %v1371_v8 }
 0x595   : > { %v728_v6 = vpop.permute.xlu0 %727 }
 0x596   : > { %v730_v32 = vsub.f32 %v1537_v7, %v728_v6 }
 0x598   : > { %740 = vperm.xlu0 %1142, %v730_v32   ;;  %v837_v32 = vpop.permute.xlu2 %836 }
 0x59d   : > { %v734_v34 = vpop.permute.xlu0 %733 }
 0x59e   : > { %v736_v8 = vmul.f32 %v734_v34, %v1621_v50  ;;  %v737_v38 = vmul.f32 %v734_v34, %v1623_v51 }
 0x5a0   : > { %1143 = vset.pattern.permute.xlu0 %v1366_v1 }
 0x5a1   : > { %776 = vperm.xlu0 %1143, %v755_v27  }
 0x5a6   : > { %v767_v4 = vpop.permute.xlu0 %766 }
 0x5a9   : > { %1148 = vset.pattern.permute.xlu0 %v1372_v9 }
 0x5aa   : > { %826 = vperm.xlu0 %1148, %v755_v27  }
 0x5b2   : > { %1150 = vset.pattern.permute.xlu0 %v1376_v20 }
 0x60a   : > { %v741_v39 = vpop.permute.xlu0 %740 }
 0x60b   : > { %v743_v40 = vadd.f32 %v741_v39, %v736_v8  ;;  %v744_v7 = vadd.f32 %v741_v39, %v737_v38 }
 0x60d   : > { %vm745_vm14 = vcmp.ge.f32.partialorder %v743_v40, 0.0  ;;  %vm746_vm15 = vcmp.ge.f32.partialorder %v744_v7, 0.0  ;;  %v751_v1 = vmul.f32 %v749_v36, %v743_v40  ;;  %v752_v0 = vmul.f32 %v749_v36, %v744_v7  ;;  %v844_v36 = vpop.permute.xlu1 %843 }
 0x60f   : > { %v753_v9 = vsel %vm745_vm14, %v743_v40, %v751_v1  ;;  %v754_v42 = vsel %vm746_vm15, %v744_v7, %v752_v0 }
 0x610   : > { %v761_v20 = vperm.slane %v753_v9, 0  ;;  %v762_v44 = vperm.slane %v754_v42, 0  ;;  %v769_v35 = vperm.slane %v753_v9, 1  ;;  %v770_v45 = vperm.slane %v754_v42, 1 }
 0x611   : > { %v779_v33 = vperm.slane %v753_v9, 2  ;;  %v780_v48 = vperm.slane %v754_v42, 2  ;;  %v789_v50 = vperm.slane %v753_v9, 3  ;;  %v790_v51 = vperm.slane %v754_v42, 3 }
 0x612   : > { %v771_v46 = vmul.f32 %v769_v35, %v767_v4  ;;  %v772_v47 = vmul.f32 %v770_v45, %v767_v4  ;;  %v763_v52 = vmul.f32 %v761_v20, %v759_v37  ;;  %v764_v53 = vmul.f32 %v762_v44, %v759_v37 }
 0x613   : > { %v777_v49 = vpop.permute.xlu0 %776  ;;  %v799_v56 = vperm.slane %v753_v9, 4  ;;  %v800_v57 = vperm.slane %v754_v42, 4  ;;  %v809_v60 = vperm.slane %v753_v9, 5  ;;  %v810_v61 = vperm.slane %v754_v42, 5 }
 0x614   : > { %v781_v54 = vmul.f32 %v779_v33, %v777_v49  ;;  %v782_v55 = vmul.f32 %v780_v48, %v777_v49  ;;  %v773_v58 = vadd.f32 %v771_v46, %v763_v52  ;;  %v774_v59 = vadd.f32 %v772_v47, %v764_v53 }
 0x615   : > { %v791_v63 = vmul.f32 %v789_v50, %v787_v41  ;;  %v792_v3 = vmul.f32 %v790_v51, %v787_v41  ;;  %v819_v12 = vperm.slane %v753_v9, 6  ;;  %v820_v13 = vperm.slane %v754_v42, 6 }
 0x616   : > { %v783_v10 = vadd.f32 %v781_v54, %v773_v58  ;;  %v784_v11 = vadd.f32 %v782_v55, %v774_v59  ;;  %v801_v17 = vmul.f32 %v799_v56, %v797_v43  ;;  %v802_v18 = vmul.f32 %v800_v57, %v797_v43 }
 0x617   : > { %v811_v5 = vmul.f32 %v809_v60, %v807_v62  ;;  %v812_v19 = vmul.f32 %v810_v61, %v807_v62  ;;  %v829_v24 = vperm.slane %v753_v9, 7  ;;  %v830_v25 = vperm.slane %v754_v42, 7 }
 0x618   : > { %v793_v15 = vadd.f32 %v791_v63, %v783_v10  ;;  %v794_v16 = vadd.f32 %v792_v3, %v784_v11  ;;  %v821_v26 = vmul.f32 %v819_v12, %v817_v14  ;;  %v822_v27 = vmul.f32 %v820_v13, %v817_v14 }
 0x61a   : > { %v803_v22 = vadd.f32 %v801_v17, %v793_v15  ;;  %v804_v23 = vadd.f32 %v802_v18, %v794_v16 }
 0x61c   : > { %v827_v21 = vpop.permute.xlu0 %826  ;;  %v813_v28 = vadd.f32 %v811_v5, %v803_v22  ;;  %v814_v29 = vadd.f32 %v812_v19, %v804_v23 }
 0x61d   : > { %v831_v30 = vmul.f32 %v829_v24, %v827_v21  ;;  %v832_v31 = vmul.f32 %v830_v25, %v827_v21 }
 0x61e   : > { %v823_v2 = vadd.f32 %v821_v26, %v813_v28  ;;  %v824_v6 = vadd.f32 %v822_v27, %v814_v29 }
 0x620   : > { %v833_v34 = vadd.f32 %v831_v30, %v823_v2  ;;  %v834_v4 = vadd.f32 %v832_v31, %v824_v6 }
 0x622   : > { %v839_v37 = vadd.f32 %v837_v32, %v833_v34  ;;  %v840_v8 = vadd.f32 %v837_v32, %v834_v4 }
 0x624   : > { %v846_v38 = vadd.f32 %v844_v36, %v839_v37  ;;  %v847_v39 = vadd.f32 %v844_v36, %v840_v8 }
 0x626   : > { %852 = vrot.lane.b32.xlu1 %v847_v39, %s1383_s18  ;;  %850 = vrot.lane.b32.xlu2 %v846_v38, %s1383_s18  ;;  %s1299_s18 = sshra.s32 %s873_s8, 4  ;;  %s1300_s18 = int_to_ptr.hbm [resolvable:$true] %s1299_s18 }
 0x627   : > { %s1301_s15 = scalar_lea.hbm %s1300_s18, 8  ;;  %p1306_p3 = scmp.lt.s32.totalorder %s1300_s18, %s1704_s7 }
 0x628   : > { %p1302_p0 = scmp.ne.s32.totalorder %s1300_s18, %s1301_s15  ;;  %p1307_p4 = scmp.lt.s32.totalorder %s1305_s20, %s1301_s15 }
 0x62a   : > { %p1303_p1 = pnand %p1302_p0, %p1462_p5  ;;  %p1308_p7 = por %p1307_p4, %p1306_p3 }
 0x62c   : > { %p1304_p2 = pneg %p1303_p1 }
 0x62e   : > { %p1309_p8 = pnand %p1308_p7, %p1304_p2 }
 0x680   : > { %v851_v40 = vpop.permute.xlu2 %850 }
 0x698   : > { %v853_v7 = vpop.permute.xlu1 %852 }
 0x699   : > { %v854_v1 = vsel %vm673_vm10, %v851_v40, %v853_v7 }
 0x69a   : > { %856 = vst [vmem:[%s341_s2] sm:$0xff] %v854_v1 }
 0x69b   : > { %1312 = shalt.err (!%p1309_p8)
}
 0x69c   : > { %1032 = dma.vmem_to_hbm [thread:$0]  (%p1462_p5), %s871_s13, 128, %s873_s8, %s858_s14  }
 0x69d PF: > { %p1059_p9 = scmp.ge.s32.totalorder %s1359_s27, 2  ;;  %s884_s21 = sand.u32 1, %s1347_s24  }
 0x69e   : > { %s885_s23 = scalar_lea.sflag [#allocation5], %s884_s21 }
 0x69f   : > { %p1048_p10 = pnand %p1059_p9, %p1466_p6 }
 0x6a1   : > { %p1049_p11 = pneg %p1048_p10 }
 0x6a3   : > { %1342 = dma.done.wait (%p1049_p11), %s885_s23, 128  }
 0x6a4   : > { %1344 = vsyncadd (%p1049_p11), %s885_s23, 4294967168  ;;  %p20_p12 = scmp.ge.s32.totalorder %s1449_s30, 4   ;;  %s1711_s24 = smov %s1351_s25 }
 0x6a5   : > { %s1712_s25 = smov %s1355_s26  ;;  %s1713_s26 = smov %s1460_s10 }
 0x6a6   : > { %s1714_s27 = smov %s1449_s30  ;;  %22 = sbr.rel (!%p20_p12) target bundleno = 8 (0x8), region = 103 }
 0x6ab   :  { %891 = vsyncpa [#allocation4], 1 }
 0x6ac   :  { %893 = vsyncpa [#allocation4 + $0x1], 1 }
 0x6ad   :  { %894 = vsyncpa [#allocation7], 1 }
 0x6ae   :  { %895 = vsyncpa [#allocation10], 1 }
 0x6af   :  { %896 = vsyncpa [#allocation5], 1 }
 0x6b0   :  { %898 = vsyncpa [#allocation5 + $0x1], 1 }

</bundles_post_ra>
